<compile_context>
chip_gen: v5e
topology: v5e:2x2
jax: 0.10.0
libtpu: 0.0.40
codegen_flags: <defaults>
</compile_context>

<pallas_src>
import jax
import jax.numpy as jnp
from jax.experimental import pallas as pl
from jax.experimental.pallas import tpu as pltpu


def _scaling_kernel(shift_ref, inv_scale_ref, x_ref, o_ref):
    # shift_ref / inv_scale_ref: (row_block, 1) VMEM, broadcast across lanes.
    # x_ref / o_ref:             (row_block, col_block) VMEM, lane-dense.
    o_ref[...] = (x_ref[...] - shift_ref[...]) * inv_scale_ref[...]


def _largest_aligned_divisor(dim, align, max_size):
    """Largest multiple of `align` that evenly divides `dim` and is <= max_size.

    If `dim` is not a multiple of `align`, fall back to the full extent (legal
    per the (8, 128) BlockSpec rule: a block dim may equal the full array dim).
    """
    if dim % align != 0:
        return dim
    best = align
    k = dim // align
    for d in range(1, k + 1):
        if k % d == 0 and align * d <= max_size:
            best = align * d
    return best


def scaling_layer1(x, shift, scale):
    """x: (N, C, H, W) float32; shift/scale: (C,) float32."""
    N, C, H, W = x.shape
    R = N * C
    L = H * W

    # Flatten to a lane-dense 2D view: rows = (n, c) pairs, cols = spatial.
    x2 = x.reshape(R, L)

    # Per-row constants (channel pattern repeated N times). inv_scale is
    # precomputed once here instead of dividing inside every grid step.
    shift_rows = jnp.tile(shift.astype(x.dtype), N).reshape(R, 1)
    inv_scale_rows = jnp.tile((1.0 / scale).astype(x.dtype), N).reshape(R, 1)

    # --- Tile selection -----------------------------------------------------
    # Lane axis: largest 128-multiple divisor of L, capped at 16384 lanes.
    col_block = _largest_aligned_divisor(L, 128, min(L, 16384))
    # Sublane axis: largest 8-multiple divisor of R such that one block stays
    # around <= 2 MiB of f32 (so 2 in-bufs + 2 out-bufs <= ~8 MiB of VMEM,
    # safe on v5e's 16 MiB default and leaving headroom on v7x's 64 MiB).
    elem_budget = (2 * 1024 * 1024) // 4
    if R % 8 == 0:
        max_rows = max(8, elem_budget // max(col_block, 1))
        row_block = _largest_aligned_divisor(R, 8, max_rows)
    else:
        row_block = R  # full extent (small R, e.g. the test's R = 6)

    grid = (R // row_block, L // col_block)

    data_spec = pl.BlockSpec((row_block, col_block), lambda i, j: (i, j))
    row_spec = pl.BlockSpec((row_block, 1), lambda i, j: (i, 0))

    out2 = pl.pallas_call(
        _scaling_kernel,
        out_shape=jax.ShapeDtypeStruct((R, L), x.dtype),
        grid_spec=pl.GridSpec(
            grid=grid,
            in_specs=[row_spec, row_spec, data_spec],
            out_specs=data_spec,
        ),
        compiler_params=pltpu.CompilerParams(
            dimension_semantics=("parallel", "parallel"),
        ),
    )(shift_rows, inv_scale_rows, x2)

    return out2.reshape(N, C, H, W)


if __name__ == "__main__":
    # Buffers matching the PyTorch module's registered buffers (C = 3).
    shift = jnp.array([-0.030, -0.088, -0.188], dtype=jnp.float32)
    scale = jnp.array([0.458, 0.448, 0.450], dtype=jnp.float32)

    # Small deterministic input: N=2, C=3 (module implies 3 channels), H=W=16.
    key = jax.random.PRNGKey(0)
    x = jax.random.normal(key, (2, 3, 16, 16), dtype=jnp.float32)

    out = scaling_layer1(x, shift, scale)
    out = jax.block_until_ready(out)

    # Reference: plain JAX broadcasting with true division.
    ref = (x - shift[None, :, None, None]) / scale[None, :, None, None]
    assert out.shape == x.shape
    assert jnp.allclose(out, ref, atol=1e-5, rtol=1e-5)

    print("KERNEL_OK")
</pallas_src>

<mosaic_0001>
module attributes {stable_mosaic.version = 11 : i64} {
  func.func @_scaling_kernel(%arg0: i32, %arg1: i32, %arg2: memref<6x1xf32, #tpu.memory_space<vmem>>, %arg3: memref<6x1xf32, #tpu.memory_space<vmem>>, %arg4: memref<6x256xf32, #tpu.memory_space<vmem>>, %arg5: memref<6x256xf32, #tpu.memory_space<vmem>>) attributes {dimension_semantics = [#tpu.dimension_semantics<parallel>, #tpu.dimension_semantics<parallel>], iteration_bounds = array<i64: 1, 1>, scalar_prefetch = 0 : i64, scratch_operands = 0 : i64, tpu.core_type = #tpu.core_type<tc>, window_params = [{transform_indices = @transform_0, window_bounds = array<i64: 6, 1>}, {transform_indices = @transform_1, window_bounds = array<i64: 6, 1>}, {transform_indices = @transform_2, window_bounds = array<i64: 6, 256>}, {transform_indices = @transform_3, window_bounds = array<i64: 6, 256>}]} {
    %c0 = arith.constant 0 : index
    %c0_0 = arith.constant 0 : index
    %0 = vector.load %arg4[%c0, %c0_0] : memref<6x256xf32, #tpu.memory_space<vmem>>, vector<6x256xf32>
    %c0_1 = arith.constant 0 : index
    %c0_2 = arith.constant 0 : index
    %1 = vector.load %arg2[%c0_1, %c0_2] : memref<6x1xf32, #tpu.memory_space<vmem>>, vector<6x1xf32>
    %2 = vector.broadcast %1 : vector<6x1xf32> to vector<6x256xf32>
    %3 = arith.subf %0, %2 : vector<6x256xf32>
    %c0_3 = arith.constant 0 : index
    %c0_4 = arith.constant 0 : index
    %4 = vector.load %arg3[%c0_3, %c0_4] : memref<6x1xf32, #tpu.memory_space<vmem>>, vector<6x1xf32>
    %5 = vector.broadcast %4 : vector<6x1xf32> to vector<6x256xf32>
    %6 = arith.mulf %3, %5 : vector<6x256xf32>
    %c0_5 = arith.constant 0 : index
    %c0_6 = arith.constant 0 : index
    %7 = vector.load %arg5[%c0_5, %c0_6] : memref<6x256xf32, #tpu.memory_space<vmem>>, vector<6x256xf32>
    tpu.vector_store %arg5[%c0_5, %c0_6], %6 {strides = array<i32>} : memref<6x256xf32, #tpu.memory_space<vmem>>, vector<6x256xf32>,
    return
  }
  func.func @transform_0(%arg0: i32, %arg1: i32) -> (i32, i32) {
    %c0_i32 = arith.constant 0 : i32
    %c0_i32_0 = arith.constant 0 : i32
    return %arg0, %c0_i32 : i32, i32
  }
  func.func @transform_1(%arg0: i32, %arg1: i32) -> (i32, i32) {
    %c0_i32 = arith.constant 0 : i32
    %c0_i32_0 = arith.constant 0 : i32
    return %arg0, %c0_i32 : i32, i32
  }
  func.func @transform_2(%arg0: i32, %arg1: i32) -> (i32, i32) {
    %c0_i32 = arith.constant 0 : i32
    return %arg0, %arg1 : i32, i32
  }
  func.func @transform_3(%arg0: i32, %arg1: i32) -> (i32, i32) {
    %c0_i32 = arith.constant 0 : i32
    return %arg0, %arg1 : i32, i32
  }
}

</mosaic_0001>

<bundles_post_ra>
// kernel: tpu_custom_call.1
= control target key start
LH: loop header
LB: loop body
LE: loop exit
PB: predicated region body
PF: predicated region fallthrough
CT: control target
= control target key end

     0   :  { %v80_v1 = vmov 0   ;;  %s117_s0 = inlined_call_operand.vmem [shape: f32[6,1], index: 0, kind: input, shape index: {}]   ;;  %s118_s1 = inlined_call_operand.vmem [shape: f32[6,1], index: 1, kind: input, shape index: {}]   ;;  %s119_s2 = inlined_call_operand.vmem [shape: f32[6,256], index: 2, kind: input, shape index: {}]   ;;  %s120_s3 = inlined_call_operand.hbm [shape: f32[6,256], index: 3, kind: output, shape index: {}]  }
   0x1   :  { %v17_v0 = vld [vmem:[%s117_s0] sm:$0x3f]  ;;  %53 = vset.pattern.permute.xlu0 %v80_v1 }
   0x2   :  { %8 = vsyncpa [#allocation3], 0  ;;  %20 = vperm.xlu0 %53, %v17_v0   ;;  %v25_v2 = vld [vmem:[%s118_s1] sm:$0x3f]  ;;  %v16_v5 = vld [vmem:[%s119_s2 + $0x8] sm:$0x3f] }
   0x3   :  { %v15_v4 = vld [vmem:[%s119_s2] sm:$0x3f]  ;;  %s81_s0 = smov [#allocation2]   ;;  %s42_s23 = sshll.u32 %s120_s3, 4  ;;  %s43_s23 = int_to_ptr.hbm [resolvable:$true] %s42_s23 }
   0x4   :  { %s40_s20 = sshll.u32 %s81_s0, 4  ;;  %s41_s20 = int_to_ptr.vmem [resolvable:$true] %s40_s20 }
   0xa   :  { %28 = vperm.xlu0 %53, %v25_v2  }
  0x74   :  { %v21_v3 = vpop.permute.xlu0 %20 }
  0x75   :  { %v23_v6 = vsub.f32 %v15_v4, %v21_v3  ;;  %v24_v7 = vsub.f32 %v16_v5, %v21_v3 }
  0x7c   :  { %v29_v8 = vpop.permute.xlu0 %28 }
  0x7d   :  { %v31_v9 = vmul.f32 %v29_v8, %v23_v6  ;;  %v32_v10 = vmul.f32 %v29_v8, %v24_v7 }
  0x7f   :  { %33 = vst [vmem:[#allocation2] sm:$0x3f] %v31_v9 }
  0x80   :  { %34 = vst [vmem:[#allocation2 + $0x8] sm:$0x3f] %v32_v10 }
  0x81   :  { %45 = dma.vmem_to_hbm [thread:$0]  %s41_s20, 256, %s43_s23, [#allocation3]  }
  0x82   :  { %78 = dma.done.wait [#allocation3], 256  }
  0x83   :  { %79 = vsyncadd [#allocation3], 4294967040 }
  0x84   :  { %50 = vsyncpa [#allocation3], 1 }

</bundles_post_ra>
